<compile_context>
chip_gen: v6e
topology: v6e:2x2x1
jax: 0.10.0
libtpu: 0.0.40
codegen_flags: <defaults>
</compile_context>

<pallas_src>
from functools import partial

import jax
import jax.numpy as jnp
from jax.experimental import pallas as pl
from jax.experimental.pallas import tpu as pltpu

INPUT_SIZE = 6
FEAT_PAD = 8            # contraction / feature dim padded 6 -> 8
HIDDEN_SIZES = [64, 32, 16]
BN_EPS = 1e-5
TILE_B_CAP = 16384      # fits the 32 MiB scoped-VMEM default on v5e/v6e/v7x
TILE_B_GRAN = 512


# ---------------------------------------------------------------------------
# Kernel: x tile is (8, TB) f32 with batch on lanes.  Weights are bf16 (out,in),
# biases are f32 (out, 1).  BN + residual_weight are already folded into W/b.
# ---------------------------------------------------------------------------
def _wrench_mlp_kernel(x_ref,
                       w1_ref, b1_ref,
                       w2_ref, b2_ref,
                       w3_ref, b3_ref,
                       w4_ref, b4_ref,
                       o_ref):
    x = x_ref[...]                                            # (8, TB) f32

    def linear(w_ref, b_ref, h_bf16):
        # bf16 (out, in) @ bf16 (in, TB) -> f32 (out, TB), + f32 bias
        return jnp.dot(w_ref[...], h_bf16,
                       preferred_element_type=jnp.float32) + b_ref[...]

    h = x.astype(jnp.bfloat16)
    h = jnp.maximum(linear(w1_ref, b1_ref, h), 0.0).astype(jnp.bfloat16)  # (64, TB)
    h = jnp.maximum(linear(w2_ref, b2_ref, h), 0.0).astype(jnp.bfloat16)  # (32, TB)
    h = jnp.maximum(linear(w3_ref, b3_ref, h), 0.0).astype(jnp.bfloat16)  # (16, TB)
    correction = linear(w4_ref, b4_ref, h)                                # (8,  TB) f32

    # residual_weight already folded into w4/b4; padded rows 6,7 are zeros.
    o_ref[...] = x + correction


# ---------------------------------------------------------------------------
# Host-side parameter folding (PyTorch layout in: W (out,in), b (out,),
# BN vectors (features,), rw (1,)).  Weights -> bf16, biases -> f32 (out,1),
# K=6 contraction dim and final output dim zero-padded to 8.
# ---------------------------------------------------------------------------
def fold_params(p):
    def bn_scale_shift(g, be, m, v):
        s = g / jnp.sqrt(v + BN_EPS)          # BN(h) = h * s + t   (post-ReLU)
        t = be - m * s
        return s, t

    s1, t1 = bn_scale_shift(p["g1"], p["be1"], p["m1"], p["v1"])
    s2, t2 = bn_scale_shift(p["g2"], p["be2"], p["m2"], p["v2"])
    s3, t3 = bn_scale_shift(p["g3"], p["be3"], p["m3"], p["v3"])

    # BN after layer k folds into layer k+1:  (h*s + t) @ W^T + b
    #   = h @ (W * s[None,:])^T + (W @ t + b)
    w1f, b1f = p["w1"], p["b1"]
    w2f, b2f = p["w2"] * s1[None, :], p["w2"] @ t1 + p["b2"]
    w3f, b3f = p["w3"] * s2[None, :], p["w3"] @ t2 + p["b3"]
    rw = p["rw"]
    w4f = rw * (p["w4"] * s3[None, :])
    b4f = rw * (p["w4"] @ t3 + p["b4"])

    # Pad the 6-wide dims to 8 (zero columns/rows contribute nothing).
    w1f = jnp.pad(w1f, ((0, 0), (0, FEAT_PAD - INPUT_SIZE)))      # (64, 8)
    w4f = jnp.pad(w4f, ((0, FEAT_PAD - INPUT_SIZE), (0, 0)))      # (8, 16)
    b4f = jnp.pad(b4f, (0, FEAT_PAD - INPUT_SIZE))                # (8,)

    def w(a):
        return a.astype(jnp.bfloat16)

    def col(b):
        return b.reshape(-1, 1).astype(jnp.float32)

    return (w(w1f), col(b1f),
            w(w2f), col(b2f),
            w(w3f), col(b3f),
            w(w4f), col(b4f))


# ---------------------------------------------------------------------------
# Batch-tile selection: no dead columns for tiny batches, >=2 grid steps when
# possible (v7x megacore), capped so per-step VMEM stays under ~14 MiB.
# ---------------------------------------------------------------------------
def _round_up(v, m):
    return ((v + m - 1) // m) * m


def _pick_tile_b(batch, cap=TILE_B_CAP, gran=TILE_B_GRAN):
    full = _round_up(batch, gran)
    if full <= gran:
        return gran
    half = _round_up(pl.cdiv(batch, 2), gran)
    return min(cap, half)


# ---------------------------------------------------------------------------
# Jitted wrapper: transpose/pad to (8, b_pad), run the batch-tiled grid,
# slice/transpose back — all fused under one jit (no standalone HBM copies).
# ---------------------------------------------------------------------------
@partial(jax.jit, static_argnames=("tile_b",))
def _wrench_forward_impl(x, folded_params, *, tile_b):
    batch = x.shape[0]
    b_pad = pl.cdiv(batch, tile_b) * tile_b

    xt = jnp.pad(x.astype(jnp.float32).T,
                 ((0, FEAT_PAD - INPUT_SIZE), (0, b_pad - batch)))  # (8, b_pad)

    def full_spec(arr):
        # tiny, grid-invariant operand: DMA'd once, resident in VMEM
        return pl.BlockSpec(arr.shape, lambda i: (0, 0))

    param_specs = [full_spec(p) for p in folded_params]

    # Rough per-step VMEM footprint (f32 intermediates + bf16 copies + I/O
    # double buffers) ~ 900 B per batch column.  Only raise the scoped limit
    # if a user-supplied tile exceeds the 32 MiB default's comfort zone.
    cparams = dict(dimension_semantics=("parallel",))
    if 900 * tile_b > 24 * 1024 * 1024:
        cparams["vmem_limit_bytes"] = 48 * 1024 * 1024

    out_t = pl.pallas_call(
        _wrench_mlp_kernel,
        out_shape=jax.ShapeDtypeStruct((FEAT_PAD, b_pad), jnp.float32),
        grid_spec=pltpu.PrefetchScalarGridSpec(
            num_scalar_prefetch=0,
            grid=(b_pad // tile_b,),
            in_specs=[pl.BlockSpec((FEAT_PAD, tile_b), lambda i: (0, i))]
                     + param_specs,
            out_specs=pl.BlockSpec((FEAT_PAD, tile_b), lambda i: (0, i)),
        ),
        compiler_params=pltpu.CompilerParams(**cparams),
    )(xt, *folded_params)

    return out_t[:INPUT_SIZE, :batch].T


def wrench_correction_mlp(x, folded_params, *, tile_b=None):
    if tile_b is None:
        tile_b = _pick_tile_b(x.shape[0])
    return _wrench_forward_impl(x, tuple(folded_params), tile_b=tile_b)


# ---------------------------------------------------------------------------
# Deterministic synthetic parameters in PyTorch layout.
# ---------------------------------------------------------------------------
def init_params(key):
    sizes = [INPUT_SIZE] + HIDDEN_SIZES + [INPUT_SIZE]
    keys = jax.random.split(key, 32)
    ki = 0
    p = {}
    for li in range(len(sizes) - 1):
        name = str(li + 1)
        fan_in, fan_out = sizes[li], sizes[li + 1]
        p[f"w{name}"] = (jax.random.normal(keys[ki], (fan_out, fan_in),
                                           jnp.float32) / jnp.sqrt(fan_in))
        ki += 1
        p[f"b{name}"] = 0.05 * jax.random.normal(keys[ki], (fan_out,),
                                                 jnp.float32)
        ki += 1
        if li < len(sizes) - 2:  # BatchNorm1d after every hidden layer
            p[f"g{name}"] = 1.0 + 0.1 * jax.random.normal(
                keys[ki], (fan_out,), jnp.float32); ki += 1
            p[f"be{name}"] = 0.05 * jax.random.normal(
                keys[ki], (fan_out,), jnp.float32); ki += 1
            p[f"m{name}"] = 0.02 * jax.random.normal(
                keys[ki], (fan_out,), jnp.float32); ki += 1
            p[f"v{name}"] = 1.0 + 0.1 * jnp.abs(jax.random.normal(
                keys[ki], (fan_out,), jnp.float32)); ki += 1
    p["rw"] = jnp.array([0.5], jnp.float32)   # residual_weight
    return p


# ---------------------------------------------------------------------------
# Pure-JAX f32 reference with the *unfolded* parameters (exact PyTorch
# semantics: Linear -> ReLU -> BatchNorm per hidden block, then x + rw * corr).
# ---------------------------------------------------------------------------
def reference_forward(x, p):
    def bn(h, g, be, m, v):
        return (h - m) * (g / jnp.sqrt(v + BN_EPS)) + be

    h = jnp.maximum(x @ p["w1"].T + p["b1"], 0.0)
    h = bn(h, p["g1"], p["be1"], p["m1"], p["v1"])
    h = jnp.maximum(h @ p["w2"].T + p["b2"], 0.0)
    h = bn(h, p["g2"], p["be2"], p["m2"], p["v2"])
    h = jnp.maximum(h @ p["w3"].T + p["b3"], 0.0)
    h = bn(h, p["g3"], p["be3"], p["m3"], p["v3"])
    correction = h @ p["w4"].T + p["b4"]
    return x + p["rw"] * correction


if __name__ == "__main__":
    key = jax.random.PRNGKey(0)
    k_params, k_x = jax.random.split(key)

    params = init_params(k_params)
    folded = fold_params(params)

    batch = 8
    x = jax.random.normal(k_x, (batch, INPUT_SIZE), jnp.float32)

    out = wrench_correction_mlp(x, folded)
    out = jax.block_until_ready(out)

    ref = reference_forward(x, params)
    assert out.shape == (batch, INPUT_SIZE)
    # Tolerance deliberately loosened vs the previous f32 kernel: the MXU now
    # consumes bf16 weights/activations (f32 accumulation), per the perf review.
    assert jnp.allclose(out, ref, atol=5e-2, rtol=5e-2), (
        "mismatch vs reference, max abs err = "
        f"{float(jnp.max(jnp.abs(out - ref)))}")

    print("KERNEL_OK")
</pallas_src>

<mosaic_0001>
module attributes {stable_mosaic.version = 11 : i64} {
  func.func @_wrench_mlp_kernel(%arg0: i32, %arg1: memref<8x512xf32, #tpu.memory_space<vmem>>, %arg2: memref<64x8xbf16, #tpu.memory_space<vmem>>, %arg3: memref<64x1xf32, #tpu.memory_space<vmem>>, %arg4: memref<32x64xbf16, #tpu.memory_space<vmem>>, %arg5: memref<32x1xf32, #tpu.memory_space<vmem>>, %arg6: memref<16x32xbf16, #tpu.memory_space<vmem>>, %arg7: memref<16x1xf32, #tpu.memory_space<vmem>>, %arg8: memref<8x16xbf16, #tpu.memory_space<vmem>>, %arg9: memref<8x1xf32, #tpu.memory_space<vmem>>, %arg10: memref<8x512xf32, #tpu.memory_space<vmem>>) attributes {dimension_semantics = [#tpu.dimension_semantics<parallel>], iteration_bounds = array<i64: 1>, scalar_prefetch = 0 : i64, scratch_operands = 0 : i64, tpu.core_type = #tpu.core_type<tc>, window_params = [{transform_indices = @transform_0, window_bounds = array<i64: 8, 512>}, {pipeline_mode = #tpu.pipeline_mode<synchronous>, transform_indices = @transform_1, window_bounds = array<i64: 64, 8>}, {pipeline_mode = #tpu.pipeline_mode<synchronous>, transform_indices = @transform_2, window_bounds = array<i64: 64, 1>}, {pipeline_mode = #tpu.pipeline_mode<synchronous>, transform_indices = @transform_3, window_bounds = array<i64: 32, 64>}, {pipeline_mode = #tpu.pipeline_mode<synchronous>, transform_indices = @transform_4, window_bounds = array<i64: 32, 1>}, {pipeline_mode = #tpu.pipeline_mode<synchronous>, transform_indices = @transform_5, window_bounds = array<i64: 16, 32>}, {pipeline_mode = #tpu.pipeline_mode<synchronous>, transform_indices = @transform_6, window_bounds = array<i64: 16, 1>}, {pipeline_mode = #tpu.pipeline_mode<synchronous>, transform_indices = @transform_7, window_bounds = array<i64: 8, 16>}, {pipeline_mode = #tpu.pipeline_mode<synchronous>, transform_indices = @transform_8, window_bounds = array<i64: 8, 1>}, {transform_indices = @transform_9, window_bounds = array<i64: 8, 512>}]} {
    %c0 = arith.constant 0 : index
    %c0_0 = arith.constant 0 : index
    %0 = vector.load %arg1[%c0, %c0_0] : memref<8x512xf32, #tpu.memory_space<vmem>>, vector<8x512xf32>
    %1 = arith.truncf %0 : vector<8x512xf32> to vector<8x512xbf16>
    %c0_1 = arith.constant 0 : index
    %c0_2 = arith.constant 0 : index
    %2 = vector.load %arg2[%c0_1, %c0_2] : memref<64x8xbf16, #tpu.memory_space<vmem>>, vector<64x8xbf16>
    %cst = arith.constant dense<0.000000e+00> : vector<64x512xf32>
    %3 = tpu.matmul %2, %1, %cst {dimension_numbers = #tpu.dot_dimension_numbers<[1], [0], [0], [1], [0, 0, 1, 1], [], []>} : vector<64x8xbf16>, vector<8x512xbf16>, vector<64x512xf32> -> vector<64x512xf32>
    %c0_3 = arith.constant 0 : index
    %c0_4 = arith.constant 0 : index
    %4 = vector.load %arg3[%c0_3, %c0_4] : memref<64x1xf32, #tpu.memory_space<vmem>>, vector<64x1xf32>
    %5 = vector.broadcast %4 : vector<64x1xf32> to vector<64x512xf32>
    %6 = arith.addf %3, %5 : vector<64x512xf32>
    %cst_5 = arith.constant 0.000000e+00 : f32
    %7 = vector.broadcast %cst_5 : f32 to vector<64x512xf32>
    %8 = arith.maximumf %6, %7 : vector<64x512xf32>
    %9 = arith.truncf %8 : vector<64x512xf32> to vector<64x512xbf16>
    %c0_6 = arith.constant 0 : index
    %c0_7 = arith.constant 0 : index
    %10 = vector.load %arg4[%c0_6, %c0_7] : memref<32x64xbf16, #tpu.memory_space<vmem>>, vector<32x64xbf16>
    %cst_8 = arith.constant dense<0.000000e+00> : vector<32x512xf32>
    %11 = tpu.matmul %10, %9, %cst_8 {dimension_numbers = #tpu.dot_dimension_numbers<[1], [0], [0], [1], [0, 0, 1, 1], [], []>} : vector<32x64xbf16>, vector<64x512xbf16>, vector<32x512xf32> -> vector<32x512xf32>
    %c0_9 = arith.constant 0 : index
    %c0_10 = arith.constant 0 : index
    %12 = vector.load %arg5[%c0_9, %c0_10] : memref<32x1xf32, #tpu.memory_space<vmem>>, vector<32x1xf32>
    %13 = vector.broadcast %12 : vector<32x1xf32> to vector<32x512xf32>
    %14 = arith.addf %11, %13 : vector<32x512xf32>
    %cst_11 = arith.constant 0.000000e+00 : f32
    %15 = vector.broadcast %cst_11 : f32 to vector<32x512xf32>
    %16 = arith.maximumf %14, %15 : vector<32x512xf32>
    %17 = arith.truncf %16 : vector<32x512xf32> to vector<32x512xbf16>
    %c0_12 = arith.constant 0 : index
    %c0_13 = arith.constant 0 : index
    %18 = vector.load %arg6[%c0_12, %c0_13] : memref<16x32xbf16, #tpu.memory_space<vmem>>, vector<16x32xbf16>
    %cst_14 = arith.constant dense<0.000000e+00> : vector<16x512xf32>
    %19 = tpu.matmul %18, %17, %cst_14 {dimension_numbers = #tpu.dot_dimension_numbers<[1], [0], [0], [1], [0, 0, 1, 1], [], []>} : vector<16x32xbf16>, vector<32x512xbf16>, vector<16x512xf32> -> vector<16x512xf32>
    %c0_15 = arith.constant 0 : index
    %c0_16 = arith.constant 0 : index
    %20 = vector.load %arg7[%c0_15, %c0_16] : memref<16x1xf32, #tpu.memory_space<vmem>>, vector<16x1xf32>
    %21 = vector.broadcast %20 : vector<16x1xf32> to vector<16x512xf32>
    %22 = arith.addf %19, %21 : vector<16x512xf32>
    %cst_17 = arith.constant 0.000000e+00 : f32
    %23 = vector.broadcast %cst_17 : f32 to vector<16x512xf32>
    %24 = arith.maximumf %22, %23 : vector<16x512xf32>
    %25 = arith.truncf %24 : vector<16x512xf32> to vector<16x512xbf16>
    %c0_18 = arith.constant 0 : index
    %c0_19 = arith.constant 0 : index
    %26 = vector.load %arg8[%c0_18, %c0_19] : memref<8x16xbf16, #tpu.memory_space<vmem>>, vector<8x16xbf16>
    %cst_20 = arith.constant dense<0.000000e+00> : vector<8x512xf32>
    %27 = tpu.matmul %26, %25, %cst_20 {dimension_numbers = #tpu.dot_dimension_numbers<[1], [0], [0], [1], [0, 0, 1, 1], [], []>} : vector<8x16xbf16>, vector<16x512xbf16>, vector<8x512xf32> -> vector<8x512xf32>
    %c0_21 = arith.constant 0 : index
    %c0_22 = arith.constant 0 : index
    %28 = vector.load %arg9[%c0_21, %c0_22] : memref<8x1xf32, #tpu.memory_space<vmem>>, vector<8x1xf32>
    %29 = vector.broadcast %28 : vector<8x1xf32> to vector<8x512xf32>
    %30 = arith.addf %27, %29 : vector<8x512xf32>
    %31 = arith.addf %0, %30 : vector<8x512xf32>
    %c0_23 = arith.constant 0 : index
    %c0_24 = arith.constant 0 : index
    %32 = vector.load %arg10[%c0_23, %c0_24] : memref<8x512xf32, #tpu.memory_space<vmem>>, vector<8x512xf32>
    tpu.vector_store %arg10[%c0_23, %c0_24], %31 {strides = array<i32>} : memref<8x512xf32, #tpu.memory_space<vmem>>, vector<8x512xf32>,
    return
  }
  func.func @transform_0(%arg0: i32) -> (i32, i32) {
    %c0_i32 = arith.constant 0 : i32
    %c0_i32_0 = arith.constant 0 : i32
    return %c0_i32, %arg0 : i32, i32
  }
  func.func @transform_1(%arg0: i32) -> (i32, i32) {
    %c0_i32 = arith.constant 0 : i32
    %c0_i32_0 = arith.constant 0 : i32
    %c0_i32_1 = arith.constant 0 : i32
    return %c0_i32, %c0_i32_0 : i32, i32
  }
  func.func @transform_2(%arg0: i32) -> (i32, i32) {
    %c0_i32 = arith.constant 0 : i32
    %c0_i32_0 = arith.constant 0 : i32
    %c0_i32_1 = arith.constant 0 : i32
    return %c0_i32, %c0_i32_0 : i32, i32
  }
  func.func @transform_3(%arg0: i32) -> (i32, i32) {
    %c0_i32 = arith.constant 0 : i32
    %c0_i32_0 = arith.constant 0 : i32
    %c0_i32_1 = arith.constant 0 : i32
    return %c0_i32, %c0_i32_0 : i32, i32
  }
  func.func @transform_4(%arg0: i32) -> (i32, i32) {
    %c0_i32 = arith.constant 0 : i32
    %c0_i32_0 = arith.constant 0 : i32
    %c0_i32_1 = arith.constant 0 : i32
    return %c0_i32, %c0_i32_0 : i32, i32
  }
  func.func @transform_5(%arg0: i32) -> (i32, i32) {
    %c0_i32 = arith.constant 0 : i32
    %c0_i32_0 = arith.constant 0 : i32
    %c0_i32_1 = arith.constant 0 : i32
    return %c0_i32, %c0_i32_0 : i32, i32
  }
  func.func @transform_6(%arg0: i32) -> (i32, i32) {
    %c0_i32 = arith.constant 0 : i32
    %c0_i32_0 = arith.constant 0 : i32
    %c0_i32_1 = arith.constant 0 : i32
    return %c0_i32, %c0_i32_0 : i32, i32
  }
  func.func @transform_7(%arg0: i32) -> (i32, i32) {
    %c0_i32 = arith.constant 0 : i32
    %c0_i32_0 = arith.constant 0 : i32
    %c0_i32_1 = arith.constant 0 : i32
    return %c0_i32, %c0_i32_0 : i32, i32
  }
  func.func @transform_8(%arg0: i32) -> (i32, i32) {
    %c0_i32 = arith.constant 0 : i32
    %c0_i32_0 = arith.constant 0 : i32
    %c0_i32_1 = arith.constant 0 : i32
    return %c0_i32, %c0_i32_0 : i32, i32
  }
  func.func @transform_9(%arg0: i32) -> (i32, i32) {
    %c0_i32 = arith.constant 0 : i32
    %c0_i32_0 = arith.constant 0 : i32
    return %c0_i32, %arg0 : i32, i32
  }
}

</mosaic_0001>

<bundles_post_ra>
// kernel: _wrench_forward_impl.1
= control target key start
LH: loop header
LB: loop body
LE: loop exit
PB: predicated region body
PF: predicated region fallthrough
CT: control target
= control target key end

     0   :  { %vm130_vm0 = vcmask 1043456   ;;  %v773_v3 = vmov 0   ;;  %vm117_vm1 = vcmask 64512   ;;  %vm375_vm2 = vcmask 523264   ;;  %s1039_s0 = inlined_call_operand.vmem [shape: f32[8,512], index: 0, kind: input, shape index: {}]   ;;  %s1040_s1 = inlined_call_operand.vmem [shape: bf16[64,8], index: 1, kind: input, shape index: {}]   ;;  %s1041_s2 = inlined_call_operand.vmem [shape: f32[64,1], index: 2, kind: input, shape index: {}]   ;;  %s1042_s4 = inlined_call_operand.vmem [shape: f32[32,1], index: 4, kind: input, shape index: {}]   ;;  %s1043_s6 = inlined_call_operand.vmem [shape: f32[16,1], index: 6, kind: input, shape index: {}]   ;;  %s1044_s8 = inlined_call_operand.vmem [shape: f32[8,1], index: 8, kind: input, shape index: {}]   ;;  %s1045_s3 = inlined_call_operand.vmem [shape: bf16[32,64], index: 3, kind: input, shape index: {}]   ;;  %s1046_s5 = inlined_call_operand.vmem [shape: bf16[16,32], index: 5, kind: input, shape index: {}]   ;;  %s1047_s7 = inlined_call_operand.vmem [shape: bf16[8,16], index: 7, kind: input, shape index: {}]   ;;  %s1048_s9 = inlined_call_operand.vmem [shape: f32[8,512], index: 9, kind: output, shape index: {}]  }
   0x1   :  { %v827_v0 = vld [vmem:[%s1039_s0 + $0x8] sm:$0xff]  ;;  %v832_v1 = vld [vmem:[%s1039_s0 + $0x18] sm:$0xff]  ;;  %v837_v2 = vld [vmem:[%s1039_s0] sm:$0xff]  ;;  %175 = vmatprep.mubr.bf16.mxu0 %v773_v3  ;;  %248 = vmatprep.mubr.bf16.mxu1 %v773_v3  ;;  %vm531_vm3 = vcmask 261120   ;;  %vm640_vm4 = vcmask 130048  }
   0x2   :  { %v38_v4 = vpack.c.bf16 %v827_v0, %v827_v0  ;;  %v40_v5 = vpack.c.bf16 %v832_v1, %v832_v1  ;;  %v37_v6 = vpack.c.bf16 %v837_v2, %v837_v2  ;;  %v850_v7 = vld [vmem:[%s1039_s0 + $0x10] sm:$0xff]  ;;  %764 = vset.pattern.permute.xlu0 %v773_v3  ;;  %765 = vset.pattern.permute.xlu1 %v773_v3  ;;  %v766_v10 = vld [vmem:[%s1040_s1] sm:$0xff]   ;;  %v56_v14 = vld [vmem:[%s1041_s2 + $0x38] sm:$0xff] }
   0x3   :  { %v39_v8 = vpack.c.bf16 %v850_v7, %v850_v7  ;;  %v55_v12 = vld [vmem:[%s1041_s2 + $0x30] sm:$0xff]  ;;  %v53_v13 = vld [vmem:[%s1041_s2 + $0x20] sm:$0xff]  ;;  %v54_v15 = vld [vmem:[%s1041_s2 + $0x28] sm:$0xff] }
   0x4   :  { %742 = vmatprep.subr.msk.bf16.mxu0 %vm130_vm0, %v38_v4  ;;  %747 = vmatprep.subr.msk.bf16.mxu1 %vm130_vm0, %v40_v5  ;;  %v132_v9 = vsel %vm130_vm0, %v37_v6, 0  ;;  %v767_v16 = vld [vmem:[%s1040_s1 + $0x8] sm:$0xff]   ;;  %v51_v17 = vld [vmem:[%s1041_s2 + $0x10] sm:$0xff]  ;;  %v52_v18 = vld [vmem:[%s1041_s2 + $0x18] sm:$0xff] }
   0x5   :  { %158 = vmatpush1.bf16.msra.mxu0 %v132_v9  ;;  %v138_v11 = vsel %vm130_vm0, %v39_v8, 0  ;;  %89 = vperm.xlu0 %764, %v55_v12   ;;  %v49_v19 = vld [vmem:[%s1041_s2] sm:$0xff]  ;;  %v50_v20 = vld [vmem:[%s1041_s2 + $0x8] sm:$0xff]  ;;  %v768_v21 = vld [vmem:[%s1040_s1 + $0x10] sm:$0xff]  }
   0x6   :  { %231 = vmatpush1.bf16.msra.mxu1 %v138_v11  ;;  %79 = vperm.xlu1 %765, %v53_v13   ;;  %v343_v22 = vld [vmem:[%s1042_s4 + $0x10] sm:$0xff]  ;;  %v344_v23 = vld [vmem:[%s1042_s4 + $0x18] sm:$0xff]  ;;  %v341_v24 = vld [vmem:[%s1042_s4] sm:$0xff] }
   0x7   :  { %v342_v25 = vld [vmem:[%s1042_s4 + $0x8] sm:$0xff]  ;;  %v769_v26 = vld [vmem:[%s1040_s1 + $0x18] sm:$0xff]   ;;  %v514_v27 = vld [vmem:[%s1043_s6] sm:$0xff] }
   0x8   :  { %743 = vmatmul.mubr.msk.bf16.vlgmr.msra.gmra.mxu0 %vm117_vm1, %v766_v10  ;;  %v515_v28 = vld [vmem:[%s1043_s6 + $0x8] sm:$0xff]  ;;  %v634_v29 = vld [vmem:[%s1044_s8] sm:$0xff] }
   0x9   :  { %748 = vmatmul.mubr.msk.bf16.vlgmr.msra.gmra.mxu1 %vm117_vm1, %v766_v10  ;;  %185 = vmatprep.mubr.bf16.mxu0 %v773_v3 }
   0xa   :  { %258 = vmatprep.mubr.bf16.mxu1 %v773_v3  ;;  %94 = vperm.xlu0 %764, %v56_v14  }
   0xb   :  { %84 = vperm.xlu1 %765, %v54_v15  }
   0xe   :  { %69 = vperm.xlu0 %764, %v51_v17  }
   0xf   :  { %74 = vperm.xlu1 %765, %v52_v18  }
  0x10   :  { %744 = vmatmul.mubr.msk.bf16.gmra.mxu0 %vm117_vm1, %v767_v16 }
  0x11   :  { %749 = vmatmul.mubr.msk.bf16.gmra.mxu1 %vm117_vm1, %v767_v16  ;;  %195 = vmatprep.mubr.bf16.mxu0 %v773_v3 }
  0x12   :  { %268 = vmatprep.mubr.bf16.mxu1 %v773_v3  ;;  %59 = vperm.xlu0 %764, %v49_v19  }
  0x13   :  { %64 = vperm.xlu1 %765, %v50_v20  }
  0x16   :  { %357 = vperm.xlu0 %764, %v343_v22  }
  0x17   :  { %362 = vperm.xlu1 %765, %v344_v23  }
  0x18   :  { %745 = vmatmul.mubr.msk.bf16.gmra.mxu0 %vm117_vm1, %v768_v21 }
  0x19   :  { %750 = vmatmul.mubr.msk.bf16.gmra.mxu1 %vm117_vm1, %v768_v21  ;;  %205 = vmatprep.mubr.bf16.mxu0 %v773_v3 }
  0x1a   :  { %278 = vmatprep.mubr.bf16.mxu1 %v773_v3  ;;  %347 = vperm.xlu0 %764, %v341_v24  }
  0x1b   :  { %352 = vperm.xlu1 %765, %v342_v25  }
  0x1e   :  { %518 = vperm.xlu0 %764, %v514_v27  }
  0x1f   :  { %523 = vperm.xlu1 %765, %v515_v28  }
  0x20   :  { %746 = vmatmul.mubr.msk.bf16.gmra.mxu0 %vm117_vm1, %v769_v26 }
  0x21   :  { %751 = vmatmul.mubr.msk.bf16.gmra.mxu1 %vm117_vm1, %v769_v26  ;;  %414 = vmatprep.mubr.bf16.mxu0 %v773_v3 }
  0x22   :  { %467 = vmatprep.mubr.bf16.mxu1 %v773_v3  ;;  %637 = vperm.xlu0 %764, %v634_v29  }
  0x80   :  { %v90_v37 = vpop.permute.xlu0 %89 }
  0x81   :  { %v941_v39 = vpop.permute.xlu1 %79 }
  0x85   :  { %v95_v45 = vpop.permute.xlu0 %94 }
  0x86   :  { %v85_v47 = vpop.permute.xlu1 %84 }
  0x89   :  { %v947_v53 = vpop.permute.xlu0 %69 }
  0x8a   :  { %v75_v55 = vpop.permute.xlu1 %74 }
  0x8d   :  { %v949_v61 = vpop.permute.xlu0 %59 }
  0x8e   :  { %v957_v5 = vpop.permute.xlu1 %64 }
  0xc8   :  { %v933_v30 = vpop.f32.mrf.mxu0 }
  0xc9   :  { %v935_v31 = vpop.f32.mrf.mxu1 }
  0xca   :  { %v179_v32 = vpop.f32.mrf.mxu0 }
  0xcb   :  { %v252_v33 = vpop.f32.mrf.mxu1  ;;  %v952_v63 = vadd.f32 %v179_v32, %v949_v61 }
  0xcc   :  { %v937_v34 = vpop.f32.mrf.mxu0  ;;  %v955_v4 = vadd.f32 %v252_v33, %v949_v61 }
  0xcd   :  { %v939_v35 = vpop.f32.mrf.mxu1 }
  0xce   :  { %v183_v36 = vpop.f32.mrf.mxu0 }
  0xcf   :  { %v256_v38 = vpop.f32.mrf.mxu1  ;;  %v960_v8 = vadd.f32 %v183_v36, %v957_v5 }
  0xd0   :  { %v943_v40 = vpop.f32.mrf.mxu0  ;;  %v963_v9 = vadd.f32 %v256_v38, %v957_v5 }
  0xd1   :  { %v945_v41 = vpop.f32.mrf.mxu1 }
  0xd2   :  { %v189_v42 = vpop.f32.mrf.mxu0 }
  0xd3   :  { %v262_v43 = vpop.f32.mrf.mxu1  ;;  %v966_v10 = vadd.f32 %v189_v42, %v947_v53 }
  0xd4   :  { %v191_v44 = vpop.f32.mrf.mxu0  ;;  %v969_v11 = vadd.f32 %v262_v43, %v947_v53 }
  0xd5   :  { %v264_v46 = vpop.f32.mrf.mxu1  ;;  %v971_v13 = vadd.f32 %v191_v44, %v75_v55 }
  0xd6   :  { %v193_v48 = vpop.f32.mrf.mxu0  ;;  %v973_v14 = vadd.f32 %v264_v46, %v75_v55 }
  0xd7   :  { %v266_v49 = vpop.f32.mrf.mxu1  ;;  %v975_v15 = vadd.f32 %v193_v48, %v75_v55 }
  0xd8   :  { %v197_v50 = vpop.f32.mrf.mxu0  ;;  %v977_v16 = vadd.f32 %v266_v49, %v75_v55 }
  0xd9   :  { %v270_v51 = vpop.f32.mrf.mxu1  ;;  %v198_v18 = vadd.f32 %v197_v50, %v941_v39 }
  0xda   :  { %v199_v52 = vpop.f32.mrf.mxu0 }
  0xdb   :  { %v272_v54 = vpop.f32.mrf.mxu1  ;;  %v200_v28 = vadd.f32 %v199_v52, %v941_v39 }
  0xdc   :  { %v201_v56 = vpop.f32.mrf.mxu0  ;;  %v273_v29 = vadd.f32 %v272_v54, %v941_v39 }
  0xdd   :  { %v274_v57 = vpop.f32.mrf.mxu1  ;;  %v202_v38 = vadd.f32 %v201_v56, %v85_v47  ;;  %v306_v52 = vmax.f32 %v200_v28, 0.0 }
  0xde   :  { %v203_v58 = vpop.f32.mrf.mxu0  ;;  %v275_v42 = vadd.f32 %v274_v57, %v85_v47 }
  0xdf   :  { %v276_v59 = vpop.f32.mrf.mxu1  ;;  %v204_v19 = vadd.f32 %v203_v58, %v85_v47 }
  0xe0   :  { %v207_v60 = vpop.f32.mrf.mxu0  ;;  %v277_v23 = vadd.f32 %v276_v59, %v85_v47  ;;  %v302_v47 = vmax.f32 %v975_v15, 0.0  ;;  %v298_v15 = vmax.f32 %v966_v10, 0.0  ;;  %v296_v10 = vmax.f32 %v963_v9, 0.0 }
  0xe1   :  { %v280_v62 = vpop.f32.mrf.mxu1  ;;  %v208_v24 = vadd.f32 %v207_v60, %v90_v37  ;;  %v310_v46 = vmax.f32 %v204_v19, 0.0 }
  0xe2   :  { %v209_v6 = vpop.f32.mrf.mxu0  ;;  %v281_v32 = vadd.f32 %v280_v62, %v90_v37  ;;  %v312_v55 = vmax.f32 %v277_v23, 0.0  ;;  %v309_v62 = vmax.f32 %v202_v38, 0.0  ;;  %v261_v23 = vadd.f32 %v945_v41, %v947_v53 }
  0xe3   :  { %v282_v12 = vpop.f32.mrf.mxu1  ;;  %v210_v20 = vadd.f32 %v209_v6, %v90_v37  ;;  %v313_v58 = vmax.f32 %v208_v24, 0.0  ;;  %v271_v6 = vadd.f32 %v270_v51, %v941_v39  ;;  %v330_v57 = vpack.c.bf16 %v310_v46, %v306_v52 }
  0xe4   :  { %v211_v17 = vpop.f32.mrf.mxu0  ;;  %v283_v25 = vadd.f32 %v282_v12, %v90_v37  ;;  %v315_v12 = vmax.f32 %v281_v32, 0.0  ;;  %v308_v37 = vmax.f32 %v273_v29, 0.0  ;;  %v182_v51 = vadd.f32 %v937_v34, %v957_v5 }
  0xe5   :  { %v212_v21 = vadd.f32 %v211_v17, %v95_v45  ;;  %v284_v22 = vpop.f32.mrf.mxu1  ;;  %v314_v48 = vmax.f32 %v210_v20, 0.0  ;;  %v188_v20 = vadd.f32 %v943_v40, %v947_v53  ;;  %v307_v24 = vmax.f32 %v271_v6, 0.0 }
  0xe6   :  { %v285_v26 = vadd.f32 %v284_v22, %v95_v45  ;;  %v213_v27 = vpop.f32.mrf.mxu0  ;;  %v316_v59 = vmax.f32 %v283_v25, 0.0  ;;  %v305_v22 = vmax.f32 %v198_v18, 0.0  ;;  %v332_v39 = vpack.c.bf16 %v312_v55, %v308_v37  ;;  %v363_v55 = vpop.permute.xlu1 %362 }
  0xe7   :  { %v214_v33 = vadd.f32 %v213_v27, %v95_v45  ;;  %v286_v36 = vpop.f32.mrf.mxu1  ;;  %v317_v43 = vmax.f32 %v212_v21, 0.0  ;;  %v304_v21 = vmax.f32 %v977_v16, 0.0  ;;  %v255_v40 = vadd.f32 %v939_v35, %v957_v5 }
  0xe8   :  { %v287_v44 = vadd.f32 %v286_v36, %v95_v45  ;;  %v319_v49 = vmax.f32 %v285_v26, 0.0  ;;  %v311_v45 = vmax.f32 %v275_v42, 0.0  ;;  %v300_v16 = vmax.f32 %v969_v11, 0.0 }
  0xe9   :  { %v318_v50 = vmax.f32 %v214_v33, 0.0  ;;  %v333_v17 = vpack.c.bf16 %v317_v43, %v313_v58  ;;  %v301_v18 = vmax.f32 %v971_v13, 0.0  ;;  %v329_v25 = vpack.c.bf16 %v309_v62, %v305_v22 }
  0xea   :  { %v320_v60 = vmax.f32 %v287_v44, 0.0  ;;  %v335_v19 = vpack.c.bf16 %v319_v49, %v315_v12  ;;  %v294_v26 = vmax.f32 %v960_v8, 0.0  ;;  %v303_v34 = vmax.f32 %v973_v14, 0.0  ;;  %v358_v49 = vpop.permute.xlu0 %357  ;;  %v353_v37 = vpop.permute.xlu1 %352 }
  0xeb   :  { %v334_v54 = vpack.c.bf16 %v318_v50, %v314_v48  ;;  %v326_v27 = vpack.c.bf16 %v302_v47, %v298_v15  ;;  %v331_v41 = vpack.c.bf16 %v311_v45, %v307_v24  ;;  %v178_v53 = vadd.f32 %v933_v30, %v949_v61 }
  0xec   :  { %v336_v56 = vpack.c.bf16 %v320_v60, %v316_v59  ;;  %v297_v28 = vmax.f32 %v188_v20, 0.0  ;;  %v328_v29 = vpack.c.bf16 %v304_v21, %v300_v16  ;;  %v251_v35 = vadd.f32 %v935_v31, %v949_v61 }
  0xed   :  { %390 = vmatprep.subr.bf16.mxu0 %v334_v54  ;;  %v290_v5 = vmax.f32 %v952_v63, 0.0  ;;  %v299_v11 = vmax.f32 %v261_v23, 0.0  ;;  %v292_v8 = vmax.f32 %v955_v4, 0.0  ;;  %v293_v13 = vmax.f32 %v182_v51, 0.0  ;;  %v770_v63 = vld [vmem:[%s1045_s3] sm:$0xff]   ;;  %v771_v4 = vld [vmem:[%s1045_s3 + $0x8] sm:$0xff]  }
  0xee   :  { %443 = vmatprep.subr.bf16.mxu1 %v336_v56  ;;  %391 = vmatpush1.bf16.msra.mxu0 %v333_v17  ;;  %v325_v14 = vpack.c.bf16 %v301_v18, %v297_v28  ;;  %v295_v32 = vmax.f32 %v255_v40, 0.0  ;;  %v289_v9 = vmax.f32 %v178_v53, 0.0  ;;  %v291_v38 = vmax.f32 %v251_v35, 0.0  ;;  %v348_v12 = vpop.permute.xlu0 %347 }
  0xef   :  { %444 = vmatpush1.bf16.msra.mxu1 %v335_v19  ;;  %392 = vmatprep.subr.bf16.mxu0 %v330_v57  ;;  %v322_v30 = vpack.c.bf16 %v294_v26, %v290_v5  ;;  %v327_v33 = vpack.c.bf16 %v303_v34, %v299_v11  ;;  %v324_v36 = vpack.c.bf16 %v296_v10, %v292_v8 }
  0xf0   :  { %445 = vmatprep.subr.bf16.mxu1 %v332_v39  ;;  %v321_v31 = vpack.c.bf16 %v293_v13, %v289_v9  ;;  %v323_v61 = vpack.c.bf16 %v295_v32, %v291_v38 }
  0xf2   :  { %393 = vmatpush1.bf16.msra.mxu0 %v329_v25 }
  0xf3   :  { %446 = vmatpush1.bf16.msra.mxu1 %v331_v41  ;;  %394 = vmatprep.subr.bf16.mxu0 %v326_v27 }
  0xf4   :  { %447 = vmatprep.subr.bf16.mxu1 %v328_v29 }
  0xf6   :  { %395 = vmatpush1.bf16.msra.mxu0 %v325_v14 }
  0xf7   :  { %448 = vmatpush1.bf16.msra.mxu1 %v327_v33  ;;  %396 = vmatprep.subr.bf16.mxu0 %v322_v30 }
  0xf8   :  { %449 = vmatprep.subr.bf16.mxu1 %v324_v36 }
  0xfa   :  { %397 = vmatpush1.bf16.msra.mxu0 %v321_v31 }
  0xfb   :  { %450 = vmatpush1.bf16.msra.mxu1 %v323_v61 }
  0xfd   :  { %754 = vmatmul.mubr.msk.bf16.vlgmr.msra.gmra.mxu0 %vm375_vm2, %v770_v63 }
  0xfe   :  { %756 = vmatmul.mubr.msk.bf16.vlgmr.msra.gmra.mxu1 %vm375_vm2, %v770_v63  ;;  %424 = vmatprep.mubr.bf16.mxu0 %v773_v3 }
  0xff   :  { %477 = vmatprep.mubr.bf16.mxu1 %v773_v3 }
 0x105   :  { %755 = vmatmul.mubr.msk.bf16.gmra.mxu0 %vm375_vm2, %v771_v4 }
 0x106   :  { %757 = vmatmul.mubr.msk.bf16.gmra.mxu1 %vm375_vm2, %v771_v4  ;;  %567 = vmatprep.mubr.bf16.mxu0 %v773_v3 }
 0x107   :  { %610 = vmatprep.mubr.bf16.mxu1 %v773_v3 }
 0x1bd   :  { %v416_v42 = vpop.f32.mrf.mxu0 }
 0x1be   :  { %v469_v43 = vpop.f32.mrf.mxu1  ;;  %v417_v17 = vadd.f32 %v416_v42, %v348_v12 }
 0x1bf   :  { %v418_v44 = vpop.f32.mrf.mxu0  ;;  %v470_v5 = vadd.f32 %v469_v43, %v348_v12  ;;  %v772_v43 = vld [vmem:[%s1046_s5] sm:$0xff]  }
 0x1c0   :  { %v471_v46 = vpop.f32.mrf.mxu1  ;;  %v419_v51 = vadd.f32 %v418_v44, %v348_v12  ;;  %v488_v31 = vmax.f32 %v417_v17, 0.0 }
 0x1c1   :  { %v420_v48 = vpop.f32.mrf.mxu0  ;;  %v472_v23 = vadd.f32 %v471_v46, %v348_v12  ;;  %v490_v63 = vmax.f32 %v470_v5, 0.0 }
 0x1c2   :  { %v473_v50 = vpop.f32.mrf.mxu1  ;;  %v421_v16 = vadd.f32 %v420_v48, %v353_v37  ;;  %v489_v11 = vmax.f32 %v419_v51, 0.0 }
 0x1c3   :  { %v422_v58 = vpop.f32.mrf.mxu0  ;;  %v474_v18 = vadd.f32 %v473_v50, %v353_v37  ;;  %v491_v14 = vmax.f32 %v472_v23, 0.0 }
 0x1c4   :  { %v475_v59 = vpop.f32.mrf.mxu1  ;;  %v423_v56 = vadd.f32 %v422_v58, %v353_v37  ;;  %v492_v32 = vmax.f32 %v421_v16, 0.0 }
 0x1c5   :  { %v426_v60 = vpop.f32.mrf.mxu0  ;;  %v476_v19 = vadd.f32 %v475_v59, %v353_v37  ;;  %v494_v9 = vmax.f32 %v474_v18, 0.0 }
 0x1c6   :  { %v479_v6 = vpop.f32.mrf.mxu1  ;;  %v427_v20 = vadd.f32 %v426_v60, %v358_v49  ;;  %v493_v34 = vmax.f32 %v423_v56, 0.0  ;;  %v504_v4 = vpack.c.bf16 %v492_v32, %v488_v31 }
 0x1c7   :  { %v428_v52 = vpop.f32.mrf.mxu0  ;;  %v480_v15 = vadd.f32 %v479_v6, %v358_v49  ;;  %v495_v10 = vmax.f32 %v476_v19, 0.0  ;;  %v506_v42 = vpack.c.bf16 %v494_v9, %v490_v63 }
 0x1c8   :  { %v481_v54 = vpop.f32.mrf.mxu1  ;;  %v429_v47 = vadd.f32 %v428_v52, %v358_v49  ;;  %v496_v28 = vmax.f32 %v427_v20, 0.0  ;;  %v505_v36 = vpack.c.bf16 %v493_v34, %v489_v11 }
 0x1c9   :  { %v430_v62 = vpop.f32.mrf.mxu0  ;;  %v482_v21 = vadd.f32 %v481_v54, %v358_v49  ;;  %v498_v8 = vmax.f32 %v480_v15, 0.0  ;;  %v507_v61 = vpack.c.bf16 %v495_v10, %v491_v14  ;;  %v519_v49 = vpop.permute.xlu0 %518 }
 0x1ca   :  { %v431_v45 = vadd.f32 %v430_v62, %v363_v55  ;;  %v483_v57 = vpop.f32.mrf.mxu1  ;;  %v497_v27 = vmax.f32 %v429_v47, 0.0 }
 0x1cb   :  { %v484_v22 = vadd.f32 %v483_v57, %v363_v55  ;;  %v432_v39 = vpop.f32.mrf.mxu0  ;;  %v499_v29 = vmax.f32 %v482_v21, 0.0 }
 0x1cc   :  { %v433_v24 = vadd.f32 %v432_v39, %v363_v55  ;;  %v485_v40 = vpop.f32.mrf.mxu1  ;;  %v500_v25 = vmax.f32 %v431_v45, 0.0 }
 0x1cd   :  { %v486_v26 = vadd.f32 %v485_v40, %v363_v55  ;;  %v502_v41 = vmax.f32 %v484_v22, 0.0  ;;  %v524_v55 = vpop.permute.xlu1 %523  ;;  %v633_v40 = vld [vmem:[%s1047_s7] sm:$0xf]  ;;  %v638_v16 = vpop.permute.xlu0 %637 }
 0x1ce   :  { %v501_v53 = vmax.f32 %v433_v24, 0.0  ;;  %v508_v30 = vpack.c.bf16 %v500_v25, %v496_v28 }
 0x1cf   :  { %v503_v35 = vmax.f32 %v486_v26, 0.0  ;;  %v510_v38 = vpack.c.bf16 %v502_v41, %v498_v8 }
 0x1d0   :  { %v509_v13 = vpack.c.bf16 %v501_v53, %v497_v27 }
 0x1d1   :  { %v511_v33 = vpack.c.bf16 %v503_v35, %v499_v29 }
 0x1d2   :  { %547 = vmatprep.subr.bf16.mxu0 %v509_v13 }
 0x1d3   :  { %590 = vmatprep.subr.bf16.mxu1 %v511_v33  ;;  %548 = vmatpush1.bf16.msra.mxu0 %v508_v30 }
 0x1d4   :  { %591 = vmatpush1.bf16.msra.mxu1 %v510_v38  ;;  %549 = vmatprep.subr.bf16.mxu0 %v505_v36 }
 0x1d5   :  { %592 = vmatprep.subr.bf16.mxu1 %v507_v61 }
 0x1d7   :  { %550 = vmatpush1.bf16.msra.mxu0 %v504_v4 }
 0x1d8   :  { %593 = vmatpush1.bf16.msra.mxu1 %v506_v42 }
 0x1da   :  { %759 = vmatmul.mubr.msk.bf16.vlgmr.msra.gmra.mxu0 %vm531_vm3, %v772_v43 }
 0x1db   :  { %760 = vmatmul.mubr.msk.bf16.vlgmr.msra.gmra.mxu1 %vm531_vm3, %v772_v43  ;;  %676 = vmatprep.mubr.bf16.mxu0 %v773_v3 }
 0x1dc   :  { %717 = vmatprep.mubr.bf16.mxu1 %v773_v3 }
 0x29a   :  { %v569_v44 = vpop.f32.mrf.mxu0 }
 0x29b   :  { %v612_v46 = vpop.f32.mrf.mxu1  ;;  %v570_v52 = vadd.f32 %v569_v44, %v519_v49 }
 0x29c   :  { %v571_v48 = vpop.f32.mrf.mxu0  ;;  %v613_v62 = vadd.f32 %v612_v46, %v519_v49 }
 0x29d   :  { %v614_v50 = vpop.f32.mrf.mxu1  ;;  %v572_v59 = vadd.f32 %v571_v48, %v519_v49  ;;  %v621_v20 = vmax.f32 %v570_v52, 0.0 }
 0x29e   :  { %v573_v58 = vpop.f32.mrf.mxu0  ;;  %v615_v12 = vadd.f32 %v614_v50, %v519_v49  ;;  %v623_v39 = vmax.f32 %v613_v62, 0.0 }
 0x29f   :  { %v574_v60 = vadd.f32 %v573_v58, %v524_v55  ;;  %v616_v6 = vpop.f32.mrf.mxu1  ;;  %v622_v3 = vmax.f32 %v572_v59, 0.0 }
 0x2a0   :  { %v617_v54 = vadd.f32 %v616_v6, %v524_v55  ;;  %v575_v37 = vpop.f32.mrf.mxu0  ;;  %v624_v21 = vmax.f32 %v615_v12, 0.0 }
 0x2a1   :  { %v576_v17 = vadd.f32 %v575_v37, %v524_v55  ;;  %v618_v56 = vpop.f32.mrf.mxu1  ;;  %v625_v47 = vmax.f32 %v574_v60, 0.0 }
 0x2a2   :  { %v619_v45 = vadd.f32 %v618_v56, %v524_v55  ;;  %v627_v57 = vmax.f32 %v617_v54, 0.0 }
 0x2a3   :  { %v626_v19 = vmax.f32 %v576_v17, 0.0  ;;  %v629_v23 = vpack.c.bf16 %v625_v47, %v621_v20 }
 0x2a4   :  { %v628_v22 = vmax.f32 %v619_v45, 0.0  ;;  %v631_v24 = vpack.c.bf16 %v627_v57, %v623_v39 }
 0x2a5   :  { %v630_v51 = vpack.c.bf16 %v626_v19, %v622_v3 }
 0x2a6   :  { %v632_v15 = vpack.c.bf16 %v628_v22, %v624_v21 }
 0x2a7   :  { %658 = vmatprep.subr.bf16.mxu0 %v630_v51 }
 0x2a8   :  { %699 = vmatprep.subr.bf16.mxu1 %v632_v15  ;;  %659 = vmatpush1.bf16.msra.mxu0 %v629_v23 }
 0x2a9   :  { %700 = vmatpush1.bf16.msra.mxu1 %v631_v24 }
 0x2ab   :  { %761 = vmatmul.mubr.msk.bf16.vlgmr.msra.gmra.mxu0 %vm640_vm4, %v633_v40 }
 0x2ac   :  { %762 = vmatmul.mubr.msk.bf16.vlgmr.msra.gmra.mxu1 %vm640_vm4, %v633_v40 }
 0x36b   :  { %v678_v18 = vpop.f32.mrf.mxu0 }
 0x36c   :  { %v679_v25 = vadd.f32 %v678_v18, %v638_v16  ;;  %v719_v26 = vpop.f32.mrf.mxu1 }
 0x36d   :  { %v720_v34 = vadd.f32 %v719_v26, %v638_v16  ;;  %v680_v27 = vpop.f32.mrf.mxu0 }
 0x36e   :  { %v726_v41 = vadd.f32 %v679_v25, %v837_v2  ;;  %v681_v53 = vadd.f32 %v680_v27, %v638_v16  ;;  %v721_v10 = vpop.f32.mrf.mxu1 }
 0x36f   :  { %v728_v28 = vadd.f32 %v720_v34, %v850_v7  ;;  %v722_v29 = vadd.f32 %v721_v10, %v638_v16  ;;  %v682_v35 = vpop.f32.mrf.mxu0 }
 0x370   :  { %730 = vst [vmem:[%s1048_s9] sm:$0xff] %v726_v41  ;;  %v727_v5 = vadd.f32 %v681_v53, %v827_v0  ;;  %v723_v11 = vpop.f32.mrf.mxu1 }
 0x371   :  { %732 = vst [vmem:[%s1048_s9 + $0x10] sm:$0xff] %v728_v28  ;;  %v729_v8 = vadd.f32 %v722_v29, %v832_v1  ;;  %v683_v2 = vpop.f32.mrf.mxu0 }
 0x372   :  { %731 = vst [vmem:[%s1048_s9 + $0x8] sm:$0xff] %v727_v5  ;;  %v724_v7 = vpop.f32.mrf.mxu1 }
 0x373   :  { %733 = vst [vmem:[%s1048_s9 + $0x18] sm:$0xff] %v729_v8 }

</bundles_post_ra>
